<compile_context>
chip_gen: v6e
topology: v6e:2x2x1
jax: 0.10.0
libtpu: 0.0.40
codegen_flags: <defaults>
</compile_context>

<pallas_src>
import math

import numpy as np

import jax
import jax.numpy as jnp
from jax import lax
from jax.experimental import pallas as pl
from jax.experimental.pallas import tpu as pltpu


def _round_up(x, m):
    return -(-x // m) * m


def _vmem_capacity_bytes():
    try:
        return int(pltpu.get_tpu_info().vmem_capacity_bytes)
    except Exception:
        return 64 * 1024 * 1024  # conservative (v7x per-TC)


def _scoped_vmem_limit(needed_bytes):
    cap = _vmem_capacity_bytes()
    return int(min(0.9 * cap, max(1.25 * needed_bytes, 32 * 1024 * 1024)))


# ---------------------------------------------------------------------------
# Kernel 1: modulated 1x1x1 conv (+ optional prev_rgb add) as VPU FMAs,
# with C as an innermost reduction grid axis (output block is the accumulator).
# ---------------------------------------------------------------------------
def _make_conv_kernel(tc, has_prev):
    def kernel(mod_ref, x_ref, *rest):
        # mod_ref: (B, C_pad) f32 in SMEM; x_ref: (1, TC, TR, 128);
        # prev_ref/o_ref: (1, TR, 128).
        if has_prev:
            prev_ref, o_ref = rest
        else:
            (o_ref,) = rest
        b = pl.program_id(0)
        k = pl.program_id(2)

        @pl.when(k == 0)
        def _():
            if has_prev:
                o_ref[0] = prev_ref[0]
            else:
                o_ref[0] = jnp.zeros(o_ref.shape[1:], o_ref.dtype)

        acc = o_ref[0]
        base = k * tc
        # tc is bounded by the VMEM plan (<= ~64), so a static FMA chain here is the
        # same code lax.fori_loop(..., unroll=True) would emit, with static indices.
        for ci in range(tc):
            acc = acc + mod_ref[b, base + ci] * x_ref[0, ci]
        o_ref[0] = acc

    return kernel


def _plan_conv_tiles(c, rows):
    cap = _vmem_capacity_bytes()
    # Generation-aware budget for the double-buffered x block:
    #   v5e/v6e (128 MiB VMEM) -> 16 MiB, v7x (64 MiB) -> ~12.8 MiB, older parts degrade.
    budget = min(16 << 20, cap // 5)
    row_bytes = 128 * 4
    max_cells = max(64, budget // (2 * row_bytes))      # cap on tc * tr
    rows8 = _round_up(max(rows, 8), 8)
    tr_target = 512
    if c * min(rows8, tr_target) <= max_cells:
        tc = c
        tr = min(rows8, 2048, max(8, ((max_cells // max(c, 1)) // 8) * 8))
    else:
        tr = min(tr_target, rows8)
        tc = max(1, min(c, max_cells // max(tr, 1)))
    tr = max(8, (tr // 8) * 8)
    return tr, tc


def modulated_gray_conv(x_tiles, prev_tiles, mod):
    """x_tiles: (B, C, R, 128) f32, prev_tiles: (B, R, 128) f32 or None, mod: (B, C) f32."""
    b, c, rows, _ = x_tiles.shape
    tr, tc = _plan_conv_tiles(c, rows)
    rows_pad = _round_up(max(rows, tr), tr)
    c_pad = _round_up(c, tc)

    if rows_pad != rows or c_pad != c:
        x_tiles = jnp.pad(
            x_tiles, ((0, 0), (0, c_pad - c), (0, rows_pad - rows), (0, 0)))
    if c_pad != c:
        mod = jnp.pad(mod, ((0, 0), (0, c_pad - c)))
    has_prev = prev_tiles is not None
    if has_prev and rows_pad != rows:
        prev_tiles = jnp.pad(prev_tiles, ((0, 0), (0, rows_pad - rows), (0, 0)))

    grid = (b, rows_pad // tr, c_pad // tc)
    in_specs = [
        pl.BlockSpec(memory_space=pltpu.MemorySpace.SMEM),             # mod (B, C) scalars
        pl.BlockSpec((1, tc, tr, 128), lambda i, j, k: (i, k, j, 0)),  # x tile
    ]
    args = [mod, x_tiles]
    if has_prev:
        in_specs.append(pl.BlockSpec((1, tr, 128), lambda i, j, k: (i, j, 0)))
        args.append(prev_tiles)

    x_buf = tc * tr * 128 * 4
    io_buf = tr * 128 * 4
    needed = 2 * x_buf + (4 if has_prev else 2) * io_buf + (2 << 20)

    out = pl.pallas_call(
        _make_conv_kernel(tc, has_prev),
        out_shape=jax.ShapeDtypeStruct((b, rows_pad, 128), jnp.float32),
        grid_spec=pltpu.PrefetchScalarGridSpec(
            num_scalar_prefetch=0,
            grid=grid,
            in_specs=in_specs,
            out_specs=pl.BlockSpec((1, tr, 128), lambda i, j, k: (i, j, 0)),
        ),
        compiler_params=pltpu.CompilerParams(
            dimension_semantics=("parallel", "parallel", "arbitrary"),
            vmem_limit_bytes=_scoped_vmem_limit(needed)),
    )(*args)
    return out[:, :rows] if rows_pad != rows else out


# ---------------------------------------------------------------------------
# Kernel 2: fused 2x trilinear upsample (align_corners=False) + [1,2,1]^3/64 blur.
# Input is H/W nearest-stretched; composed interpolation+blur stencils are applied
# with resident precomputed per-lane / per-row weights (boundary replicate folded in).
# ---------------------------------------------------------------------------
def _axis_weight_rows(hh, ww):
    """(6, 4HW) f32: [wm_w, wc_w, wp_w, wm_h, wc_h, wp_h] over the flattened (2H,2W) lanes."""
    h2, w2 = 2 * hh, 2 * ww
    lane = np.arange(h2 * w2)

    def fold(idx, n2):
        even = (idx % 2) == 0
        m = np.where(even, 1.25, 0.25)
        p = np.where(even, 0.25, 1.25)
        c = np.full(idx.shape, 2.5)
        left = idx < 2
        right = idx >= n2 - 2
        c = c + np.where(left, m, 0.0) + np.where(right, p, 0.0)
        m = np.where(left, 0.0, m)
        p = np.where(right, 0.0, p)
        return 0.25 * m, 0.25 * c, 0.25 * p

    wm_w, wc_w, wp_w = fold(lane % w2, w2)
    wm_h, wc_h, wp_h = fold(lane // w2, h2)
    return np.stack([wm_w, wc_w, wp_w, wm_h, wc_h, wp_h]).astype(np.float32)


def _depth_weight_cols(dd):
    """(D, 6) f32 columns [em, ec, ep, om, oc, op] for even/odd output planes."""
    d = np.arange(dd)
    first = d == 0
    last = d == dd - 1
    em = np.where(first, 0.0, 1.25)
    ep = np.where(last, 0.0, 0.25)
    ec = 2.5 + np.where(first, 1.25, 0.0) + np.where(last, 0.25, 0.0)
    om = np.where(first, 0.0, 0.25)
    op = np.where(last, 0.0, 1.25)
    oc = 2.5 + np.where(first, 0.25, 0.0) + np.where(last, 1.25, 0.0)
    cols = np.stack([em, ec, ep, om, oc, op], axis=1) * 0.25
    return cols.astype(np.float32)


def _make_ups_blur_kernel(dd, hh, ww):
    w2 = 2 * ww
    hw4 = 2 * hh * w2

    def _shift(v, s):
        # out[..., i] = v[..., i - s] along lanes (jnp.roll semantics); wrap-around taps
        # carry zero weight (folded into the centre), so no masking is needed.
        s = s % hw4
        return v if s == 0 else pltpu.roll(v, s, axis=1)

    def kernel(w_ref, dw_ref, x_ref, o_ref):
        v = x_ref[0]                                                   # (D, 4*H*W) f32
        # W axis: fused upsample+blur = 3-tap stencil (2 rolls + 5 FMAs).
        v = (w_ref[0:1, :] * _shift(v, 2)
             + w_ref[1:2, :] * v
             + w_ref[2:3, :] * _shift(v, -2))
        # H axis: same stencil, lane stride 2*(2W).
        v = (w_ref[3:4, :] * _shift(v, 2 * w2)
             + w_ref[4:5, :] * v
             + w_ref[5:6, :] * _shift(v, -(2 * w2)))
        # D axis (unstretched): sublane rolls, even/odd output planes -> two lane halves
        # so the final (B,1,2D,2H,2W) view is a free reshape outside the kernel.
        if dd > 1:
            vm = pltpu.roll(v, 1, axis=0)        # v[d-1] (wrap carries zero weight)
            vp = pltpu.roll(v, dd - 1, axis=0)   # v[d+1]
        else:
            vm = v
            vp = v
        dw = dw_ref[...]
        o_ref[0, :, 0:hw4] = dw[:, 0:1] * vm + dw[:, 1:2] * v + dw[:, 2:3] * vp
        o_ref[0, :, hw4:2 * hw4] = dw[:, 3:4] * vm + dw[:, 4:5] * v + dw[:, 5:6] * vp

    return kernel


def fused_upsample_blur(x_nn, dd, hh, ww):
    """x_nn: (B, D, 4*H*W) f32 -- H/W nearest-stretched, (2H, 2W) flattened into lanes."""
    b = x_nn.shape[0]
    hw4 = 4 * hh * ww
    axis_w = jnp.asarray(_axis_weight_rows(hh, ww))     # (6, 4HW), resident
    depth_w = jnp.asarray(_depth_weight_cols(dd))       # (D, 6), resident
    vol = dd * hw4 * 4
    needed = 16 * vol + (6 * hw4 + 6 * dd) * 4 + (2 << 20)
    return pl.pallas_call(
        _make_ups_blur_kernel(dd, hh, ww),
        out_shape=jax.ShapeDtypeStruct((b, dd, 2 * hw4), jnp.float32),
        grid_spec=pltpu.PrefetchScalarGridSpec(
            num_scalar_prefetch=0,
            grid=(b,),
            in_specs=[pl.BlockSpec((6, hw4), lambda i: (0, 0)),
                      pl.BlockSpec((dd, 6), lambda i: (0, 0)),
                      pl.BlockSpec((1, dd, hw4), lambda i: (i, 0, 0))],
            out_specs=pl.BlockSpec((1, dd, 2 * hw4), lambda i: (i, 0, 0)),
        ),
        compiler_params=pltpu.CompilerParams(
            dimension_semantics=("parallel",),
            vmem_limit_bytes=_scoped_vmem_limit(needed)),
    )(axis_w, depth_w, x_nn)


# ---------------------------------------------------------------------------
# GrayscaleBlock: params + forward
# ---------------------------------------------------------------------------
def init_grayscale_block(key, latent_dim, input_channel):
    k1, k2, k3 = jax.random.split(key, 3)
    w_style = jax.random.normal(k1, (latent_dim, input_channel), jnp.float32) / math.sqrt(latent_dim)
    b_style = (jax.random.uniform(k2, (1, input_channel), jnp.float32) - 0.5) * (
        2.0 / math.sqrt(latent_dim))
    conv_w = jax.random.normal(k3, (1, input_channel), jnp.float32) * math.sqrt(
        2.0 / input_channel)
    return dict(w_style=w_style, b_style=b_style, conv_w=conv_w)


def grayscale_block_forward(params, x, prev_rgb, istyle, upsample=True):
    b, c, d, h, w = x.shape
    s = d * h * w
    x = x.astype(jnp.float32)
    istyle = istyle.astype(jnp.float32)

    # Style Linear + modulation folded into a tiny (B, C) weight (XLA; negligible work).
    style = istyle @ params["w_style"] + params["b_style"]          # (B, C)
    mod = params["conv_w"] * (style + 1.0)                          # (B, C)

    s_pad = _round_up(s, 128)
    x_flat = x.reshape(b, c, s)
    if s_pad != s:
        x_flat = jnp.pad(x_flat, ((0, 0), (0, 0), (0, s_pad - s)))
    x_tiles = x_flat.reshape(b, c, s_pad // 128, 128)

    prev_tiles = None
    if prev_rgb is not None:
        prev_flat = prev_rgb.astype(jnp.float32).reshape(b, s)
        if s_pad != s:
            prev_flat = jnp.pad(prev_flat, ((0, 0), (0, s_pad - s)))
        prev_tiles = prev_flat.reshape(b, s_pad // 128, 128)

    y = modulated_gray_conv(x_tiles, prev_tiles, mod)               # (B, R, 128)
    y = y.reshape(b, s_pad)
    if s_pad != s:
        y = y[:, :s]
    y = y.reshape(b, d, h, w)

    if not upsample:
        return y.reshape(b, 1, d, h, w)

    # 2x nearest stretch of H/W (index duplication) stays in XLA; the trilinear
    # interpolation weights and the blur are fused into the Pallas kernel.
    y_nn = jnp.repeat(jnp.repeat(y, 2, axis=2), 2, axis=3)          # (B, D, 2H, 2W)
    out = fused_upsample_blur(y_nn.reshape(b, d, 4 * h * w), d, h, w)
    return out.reshape(b, 1, 2 * d, 2 * h, 2 * w)                   # free reshape


# ---------------------------------------------------------------------------
# Pure-JAX reference (for correctness validation in __main__)
# ---------------------------------------------------------------------------
def _ref_upsample_axis(x, axis):
    n = x.shape[axis]
    i = jnp.arange(2 * n, dtype=jnp.float32)
    coord = (i + 0.5) / 2.0 - 0.5
    left = jnp.floor(coord)
    frac = coord - left
    li = jnp.clip(left.astype(jnp.int32), 0, n - 1)
    ri = jnp.clip(left.astype(jnp.int32) + 1, 0, n - 1)
    xl = jnp.take(x, li, axis=axis)
    xr = jnp.take(x, ri, axis=axis)
    shape = [1] * x.ndim
    shape[axis] = 2 * n
    frac = frac.reshape(shape)
    return xl * (1.0 - frac) + xr * frac


def _ref_blur(x):
    def blur_axis(v, axis):
        pad = [(0, 0)] * v.ndim
        pad[axis] = (1, 1)
        vp = jnp.pad(v, pad, mode="edge")
        n = v.shape[axis]
        a = lax.slice_in_dim(vp, 0, n, axis=axis)
        bm = lax.slice_in_dim(vp, 1, n + 1, axis=axis)
        cp = lax.slice_in_dim(vp, 2, n + 2, axis=axis)
        return (a + 2.0 * bm + cp) / 4.0
    for ax in (2, 3, 4):
        x = blur_axis(x, ax)
    return x


def _ref_forward(params, x, prev_rgb, istyle, upsample=True):
    style = istyle.astype(jnp.float32) @ params["w_style"] + params["b_style"]
    weights = params["conv_w"] * (style + 1.0)                      # (B, C)
    y = jnp.einsum("bc,bcdhw->bdhw", weights, x.astype(jnp.float32))[:, None]
    if prev_rgb is not None:
        y = y + prev_rgb.astype(jnp.float32)
    if not upsample:
        return y
    for ax in (2, 3, 4):
        y = _ref_upsample_axis(y, ax)
    return _ref_blur(y)


if __name__ == "__main__":
    key = jax.random.PRNGKey(0)
    kx, kp, ks, kparam = jax.random.split(key, 4)

    b, c, latent = 2, 4, 32
    d = h = w = 8

    x = jax.random.normal(kx, (b, c, d, h, w), jnp.float32)
    prev_rgb = jax.random.normal(kp, (b, 1, d, h, w), jnp.float32)
    istyle = jax.random.normal(ks, (b, latent), jnp.float32)

    params = init_grayscale_block(kparam, latent, c)
    fwd = jax.jit(grayscale_block_forward, static_argnames=("upsample",))

    # upsample path with prev_rgb
    out = fwd(params, x, prev_rgb, istyle, upsample=True)
    out = jax.block_until_ready(out)
    assert out.shape == (b, 1, 2 * d, 2 * h, 2 * w), out.shape
    assert out.dtype == jnp.float32
    ref = _ref_forward(params, x, prev_rgb, istyle, upsample=True)
    assert jnp.allclose(out, ref, rtol=1e-4, atol=1e-4), float(jnp.max(jnp.abs(out - ref)))

    # no-upsample / no-prev_rgb path
    out2 = fwd(params, x, None, istyle, upsample=False)
    out2 = jax.block_until_ready(out2)
    assert out2.shape == (b, 1, d, h, w), out2.shape
    ref2 = _ref_forward(params, x, None, istyle, upsample=False)
    assert jnp.allclose(out2, ref2, rtol=1e-4, atol=1e-4), float(jnp.max(jnp.abs(out2 - ref2)))

    print("KERNEL_OK")
</pallas_src>

<mosaic_0001>
module attributes {stable_mosaic.version = 11 : i64} {
  func.func @kernel(%arg0: i32, %arg1: i32, %arg2: i32, %arg3: memref<2x4xf32, #tpu.memory_space<smem>>, %arg4: memref<1x4x8x128xf32, #tpu.memory_space<vmem>>, %arg5: memref<1x8x128xf32, #tpu.memory_space<vmem>>, %arg6: memref<1x8x128xf32, #tpu.memory_space<vmem>>) attributes {dimension_semantics = [#tpu.dimension_semantics<parallel>, #tpu.dimension_semantics<parallel>, #tpu.dimension_semantics<arbitrary>], iteration_bounds = array<i64: 2, 1, 1>, scalar_prefetch = 0 : i64, scratch_operands = 0 : i64, tpu.core_type = #tpu.core_type<tc>, window_params = [{transform_indices = @transform_0, window_bounds = array<i64: 2, 4>}, {transform_indices = @transform_1, window_bounds = array<i64: 1, 4, 8, 128>}, {transform_indices = @transform_2, window_bounds = array<i64: 1, 8, 128>}, {transform_indices = @transform_3, window_bounds = array<i64: 1, 8, 128>}]} {
    %c0_i32 = arith.constant 0 : i32
    %0 = arith.cmpi eq, %arg2, %c0_i32 : i32
    %1 = arith.extui %0 : i1 to i32
    %c0_i32_0 = arith.constant 0 : i32
    %2 = arith.cmpi ne, %1, %c0_i32_0 : i32
    scf.if %2 {
      %c0_20 = arith.constant 0 : index
      %c0_21 = arith.constant 0 : index
      %c0_22 = arith.constant 0 : index
      %45 = vector.load %arg5[%c0_20, %c0_21, %c0_22] : memref<1x8x128xf32, #tpu.memory_space<vmem>>, vector<1x8x128xf32>
      %46 = vector.shape_cast %45 : vector<1x8x128xf32> to vector<8x128xf32>
      %c0_23 = arith.constant 0 : index
      %c0_24 = arith.constant 0 : index
      %c0_25 = arith.constant 0 : index
      %47 = vector.load %arg6[%c0_23, %c0_24, %c0_25] : memref<1x8x128xf32, #tpu.memory_space<vmem>>, vector<1x8x128xf32>
      %48 = vector.shape_cast %47 : vector<1x8x128xf32> to vector<8x128xf32>
      %49 = vector.shape_cast %46 : vector<8x128xf32> to vector<1x8x128xf32>
      tpu.vector_store %arg6[%c0_23, %c0_24, %c0_25], %49 {strides = array<i32>} : memref<1x8x128xf32, #tpu.memory_space<vmem>>, vector<1x8x128xf32>,
    } else {
    }
    %c0 = arith.constant 0 : index
    %c0_1 = arith.constant 0 : index
    %c0_2 = arith.constant 0 : index
    %3 = vector.load %arg6[%c0, %c0_1, %c0_2] : memref<1x8x128xf32, #tpu.memory_space<vmem>>, vector<1x8x128xf32>
    %4 = vector.shape_cast %3 : vector<1x8x128xf32> to vector<8x128xf32>
    %c4_i32 = arith.constant 4 : i32
    %5 = arith.muli %arg2, %c4_i32 : i32
    %c0_i32_3 = arith.constant 0 : i32
    %6 = arith.addi %5, %c0_i32_3 : i32
    %7 = arith.index_cast %arg0 : i32 to index
    %8 = arith.index_cast %6 : i32 to index
    %9 = memref.load %arg3[%7, %8] : memref<2x4xf32, #tpu.memory_space<smem>>
    %c0_4 = arith.constant 0 : index
    %c0_5 = arith.constant 0 : index
    %c0_6 = arith.constant 0 : index
    %c0_7 = arith.constant 0 : index
    %10 = vector.load %arg4[%c0_4, %c0_5, %c0_6, %c0_7] : memref<1x4x8x128xf32, #tpu.memory_space<vmem>>, vector<1x1x8x128xf32>
    %11 = vector.shape_cast %10 : vector<1x1x8x128xf32> to vector<8x128xf32>
    %12 = vector.broadcast %9 : f32 to vector<8x128xf32>
    %13 = arith.mulf %12, %11 : vector<8x128xf32>
    %14 = arith.addf %4, %13 : vector<8x128xf32>
    %c1_i32 = arith.constant 1 : i32
    %15 = arith.addi %5, %c1_i32 : i32
    %16 = arith.index_cast %arg0 : i32 to index
    %17 = arith.index_cast %15 : i32 to index
    %18 = memref.load %arg3[%16, %17] : memref<2x4xf32, #tpu.memory_space<smem>>
    %c0_8 = arith.constant 0 : index
    %c1 = arith.constant 1 : index
    %c0_9 = arith.constant 0 : index
    %c0_10 = arith.constant 0 : index
    %19 = vector.load %arg4[%c0_8, %c1, %c0_9, %c0_10] : memref<1x4x8x128xf32, #tpu.memory_space<vmem>>, vector<1x1x8x128xf32>
    %20 = vector.shape_cast %19 : vector<1x1x8x128xf32> to vector<8x128xf32>
    %21 = vector.broadcast %18 : f32 to vector<8x128xf32>
    %22 = arith.mulf %21, %20 : vector<8x128xf32>
    %23 = arith.addf %14, %22 : vector<8x128xf32>
    %c2_i32 = arith.constant 2 : i32
    %24 = arith.addi %5, %c2_i32 : i32
    %25 = arith.index_cast %arg0 : i32 to index
    %26 = arith.index_cast %24 : i32 to index
    %27 = memref.load %arg3[%25, %26] : memref<2x4xf32, #tpu.memory_space<smem>>
    %c0_11 = arith.constant 0 : index
    %c2 = arith.constant 2 : index
    %c0_12 = arith.constant 0 : index
    %c0_13 = arith.constant 0 : index
    %28 = vector.load %arg4[%c0_11, %c2, %c0_12, %c0_13] : memref<1x4x8x128xf32, #tpu.memory_space<vmem>>, vector<1x1x8x128xf32>
    %29 = vector.shape_cast %28 : vector<1x1x8x128xf32> to vector<8x128xf32>
    %30 = vector.broadcast %27 : f32 to vector<8x128xf32>
    %31 = arith.mulf %30, %29 : vector<8x128xf32>
    %32 = arith.addf %23, %31 : vector<8x128xf32>
    %c3_i32 = arith.constant 3 : i32
    %33 = arith.addi %5, %c3_i32 : i32
    %34 = arith.index_cast %arg0 : i32 to index
    %35 = arith.index_cast %33 : i32 to index
    %36 = memref.load %arg3[%34, %35] : memref<2x4xf32, #tpu.memory_space<smem>>
    %c0_14 = arith.constant 0 : index
    %c3 = arith.constant 3 : index
    %c0_15 = arith.constant 0 : index
    %c0_16 = arith.constant 0 : index
    %37 = vector.load %arg4[%c0_14, %c3, %c0_15, %c0_16] : memref<1x4x8x128xf32, #tpu.memory_space<vmem>>, vector<1x1x8x128xf32>
    %38 = vector.shape_cast %37 : vector<1x1x8x128xf32> to vector<8x128xf32>
    %39 = vector.broadcast %36 : f32 to vector<8x128xf32>
    %40 = arith.mulf %39, %38 : vector<8x128xf32>
    %41 = arith.addf %32, %40 : vector<8x128xf32>
    %c0_17 = arith.constant 0 : index
    %c0_18 = arith.constant 0 : index
    %c0_19 = arith.constant 0 : index
    %42 = vector.load %arg6[%c0_17, %c0_18, %c0_19] : memref<1x8x128xf32, #tpu.memory_space<vmem>>, vector<1x8x128xf32>
    %43 = vector.shape_cast %42 : vector<1x8x128xf32> to vector<8x128xf32>
    %44 = vector.shape_cast %41 : vector<8x128xf32> to vector<1x8x128xf32>
    tpu.vector_store %arg6[%c0_17, %c0_18, %c0_19], %44 {strides = array<i32>} : memref<1x8x128xf32, #tpu.memory_space<vmem>>, vector<1x8x128xf32>,
    return
  }
  func.func @transform_0(%arg0: i32, %arg1: i32, %arg2: i32) -> (i32, i32) {
    %c0_i32 = arith.constant 0 : i32
    %c0_i32_0 = arith.constant 0 : i32
    %c0_i32_1 = arith.constant 0 : i32
    return %c0_i32, %c0_i32_0 : i32, i32
  }
  func.func @transform_1(%arg0: i32, %arg1: i32, %arg2: i32) -> (i32, i32, i32, i32) {
    %c0_i32 = arith.constant 0 : i32
    %c0_i32_0 = arith.constant 0 : i32
    return %arg0, %arg2, %arg1, %c0_i32 : i32, i32, i32, i32
  }
  func.func @transform_2(%arg0: i32, %arg1: i32, %arg2: i32) -> (i32, i32, i32) {
    %c0_i32 = arith.constant 0 : i32
    %c0_i32_0 = arith.constant 0 : i32
    return %arg0, %arg1, %c0_i32 : i32, i32, i32
  }
  func.func @transform_3(%arg0: i32, %arg1: i32, %arg2: i32) -> (i32, i32, i32) {
    %c0_i32 = arith.constant 0 : i32
    %c0_i32_0 = arith.constant 0 : i32
    return %arg0, %arg1, %c0_i32 : i32, i32, i32
  }
}

module attributes {stable_mosaic.version = 11 : i64} {
  func.func @kernel(%arg0: i32, %arg1: memref<6x256xf32, #tpu.memory_space<vmem>>, %arg2: memref<8x6xf32, #tpu.memory_space<vmem>>, %arg3: memref<1x8x256xf32, #tpu.memory_space<vmem>>, %arg4: memref<1x8x512xf32, #tpu.memory_space<vmem>>) attributes {dimension_semantics = [#tpu.dimension_semantics<parallel>], iteration_bounds = array<i64: 2>, scalar_prefetch = 0 : i64, scratch_operands = 0 : i64, tpu.core_type = #tpu.core_type<tc>, window_params = [{pipeline_mode = #tpu.pipeline_mode<synchronous>, transform_indices = @transform_0, window_bounds = array<i64: 6, 256>}, {pipeline_mode = #tpu.pipeline_mode<synchronous>, transform_indices = @transform_1, window_bounds = array<i64: 8, 6>}, {transform_indices = @transform_2, window_bounds = array<i64: 1, 8, 256>}, {transform_indices = @transform_3, window_bounds = array<i64: 1, 8, 512>}]} {
    %c0 = arith.constant 0 : index
    %c0_0 = arith.constant 0 : index
    %c0_1 = arith.constant 0 : index
    %0 = vector.load %arg3[%c0, %c0_0, %c0_1] : memref<1x8x256xf32, #tpu.memory_space<vmem>>, vector<1x8x256xf32>
    %1 = vector.shape_cast %0 : vector<1x8x256xf32> to vector<8x256xf32>
    %c0_2 = arith.constant 0 : index
    %c0_3 = arith.constant 0 : index
    %2 = vector.load %arg1[%c0_2, %c0_3] : memref<6x256xf32, #tpu.memory_space<vmem>>, vector<1x256xf32>
    %c2_i32 = arith.constant 2 : i32
    %3 = tpu.dynamic_rotate %1 by %c2_i32 dim 1 : vector<8x256xf32>, i32 -> vector<8x256xf32>
    %4 = vector.broadcast %2 : vector<1x256xf32> to vector<8x256xf32>
    %5 = arith.mulf %4, %3 : vector<8x256xf32>
    %c1 = arith.constant 1 : index
    %c0_4 = arith.constant 0 : index
    %6 = vector.load %arg1[%c1, %c0_4] : memref<6x256xf32, #tpu.memory_space<vmem>>, vector<1x256xf32>
    %7 = vector.broadcast %6 : vector<1x256xf32> to vector<8x256xf32>
    %8 = arith.mulf %7, %1 : vector<8x256xf32>
    %9 = arith.addf %5, %8 : vector<8x256xf32>
    %c2 = arith.constant 2 : index
    %c0_5 = arith.constant 0 : index
    %10 = vector.load %arg1[%c2, %c0_5] : memref<6x256xf32, #tpu.memory_space<vmem>>, vector<1x256xf32>
    %c254_i32 = arith.constant 254 : i32
    %11 = tpu.dynamic_rotate %1 by %c254_i32 dim 1 : vector<8x256xf32>, i32 -> vector<8x256xf32>
    %12 = vector.broadcast %10 : vector<1x256xf32> to vector<8x256xf32>
    %13 = arith.mulf %12, %11 : vector<8x256xf32>
    %14 = arith.addf %9, %13 : vector<8x256xf32>
    %c3 = arith.constant 3 : index
    %c0_6 = arith.constant 0 : index
    %15 = vector.load %arg1[%c3, %c0_6] : memref<6x256xf32, #tpu.memory_space<vmem>>, vector<1x256xf32>
    %c32_i32 = arith.constant 32 : i32
    %16 = tpu.dynamic_rotate %14 by %c32_i32 dim 1 : vector<8x256xf32>, i32 -> vector<8x256xf32>
    %17 = vector.broadcast %15 : vector<1x256xf32> to vector<8x256xf32>
    %18 = arith.mulf %17, %16 : vector<8x256xf32>
    %c4 = arith.constant 4 : index
    %c0_7 = arith.constant 0 : index
    %19 = vector.load %arg1[%c4, %c0_7] : memref<6x256xf32, #tpu.memory_space<vmem>>, vector<1x256xf32>
    %20 = vector.broadcast %19 : vector<1x256xf32> to vector<8x256xf32>
    %21 = arith.mulf %20, %14 : vector<8x256xf32>
    %22 = arith.addf %18, %21 : vector<8x256xf32>
    %c5 = arith.constant 5 : index
    %c0_8 = arith.constant 0 : index
    %23 = vector.load %arg1[%c5, %c0_8] : memref<6x256xf32, #tpu.memory_space<vmem>>, vector<1x256xf32>
    %c224_i32 = arith.constant 224 : i32
    %24 = tpu.dynamic_rotate %14 by %c224_i32 dim 1 : vector<8x256xf32>, i32 -> vector<8x256xf32>
    %25 = vector.broadcast %23 : vector<1x256xf32> to vector<8x256xf32>
    %26 = arith.mulf %25, %24 : vector<8x256xf32>
    %27 = arith.addf %22, %26 : vector<8x256xf32>
    %c1_i32 = arith.constant 1 : i32
    %28 = tpu.dynamic_rotate %27 by %c1_i32 dim 0 : vector<8x256xf32>, i32 -> vector<8x256xf32>
    %c7_i32 = arith.constant 7 : i32
    %29 = tpu.dynamic_rotate %27 by %c7_i32 dim 0 : vector<8x256xf32>, i32 -> vector<8x256xf32>
    %c0_9 = arith.constant 0 : index
    %c0_10 = arith.constant 0 : index
    %30 = vector.load %arg2[%c0_9, %c0_10] : memref<8x6xf32, #tpu.memory_space<vmem>>, vector<8x6xf32>
    %31 = vector.extract_strided_slice %30 {offsets = [0, 0], sizes = [8, 1], strides = [1, 1]} : vector<8x6xf32> to vector<8x1xf32>
    %32 = vector.broadcast %31 : vector<8x1xf32> to vector<8x256xf32>
    %33 = arith.mulf %32, %28 : vector<8x256xf32>
    %34 = vector.extract_strided_slice %30 {offsets = [0, 1], sizes = [8, 1], strides = [1, 1]} : vector<8x6xf32> to vector<8x1xf32>
    %35 = vector.broadcast %34 : vector<8x1xf32> to vector<8x256xf32>
    %36 = arith.mulf %35, %27 : vector<8x256xf32>
    %37 = arith.addf %33, %36 : vector<8x256xf32>
    %38 = vector.extract_strided_slice %30 {offsets = [0, 2], sizes = [8, 1], strides = [1, 1]} : vector<8x6xf32> to vector<8x1xf32>
    %39 = vector.broadcast %38 : vector<8x1xf32> to vector<8x256xf32>
    %40 = arith.mulf %39, %29 : vector<8x256xf32>
    %41 = arith.addf %37, %40 : vector<8x256xf32>
    %c0_11 = arith.constant 0 : index
    %c0_12 = arith.constant 0 : index
    %c0_13 = arith.constant 0 : index
    %42 = vector.load %arg4[%c0_11, %c0_12, %c0_13] : memref<1x8x512xf32, #tpu.memory_space<vmem>>, vector<1x8x256xf32>
    %43 = vector.shape_cast %42 : vector<1x8x256xf32> to vector<8x256xf32>
    %44 = vector.shape_cast %41 : vector<8x256xf32> to vector<1x8x256xf32>
    tpu.vector_store %arg4[%c0_11, %c0_12, %c0_13], %44 {strides = array<i32>} : memref<1x8x512xf32, #tpu.memory_space<vmem>>, vector<1x8x256xf32>,
    %45 = vector.extract_strided_slice %30 {offsets = [0, 3], sizes = [8, 1], strides = [1, 1]} : vector<8x6xf32> to vector<8x1xf32>
    %46 = vector.broadcast %45 : vector<8x1xf32> to vector<8x256xf32>
    %47 = arith.mulf %46, %28 : vector<8x256xf32>
    %48 = vector.extract_strided_slice %30 {offsets = [0, 4], sizes = [8, 1], strides = [1, 1]} : vector<8x6xf32> to vector<8x1xf32>
    %49 = vector.broadcast %48 : vector<8x1xf32> to vector<8x256xf32>
    %50 = arith.mulf %49, %27 : vector<8x256xf32>
    %51 = arith.addf %47, %50 : vector<8x256xf32>
    %52 = vector.extract_strided_slice %30 {offsets = [0, 5], sizes = [8, 1], strides = [1, 1]} : vector<8x6xf32> to vector<8x1xf32>
    %53 = vector.broadcast %52 : vector<8x1xf32> to vector<8x256xf32>
    %54 = arith.mulf %53, %29 : vector<8x256xf32>
    %55 = arith.addf %51, %54 : vector<8x256xf32>
    %c0_14 = arith.constant 0 : index
    %c0_15 = arith.constant 0 : index
    %c256 = arith.constant 256 : index
    %56 = vector.load %arg4[%c0_14, %c0_15, %c256] : memref<1x8x512xf32, #tpu.memory_space<vmem>>, vector<1x8x256xf32>
    %57 = vector.shape_cast %56 : vector<1x8x256xf32> to vector<8x256xf32>
    %58 = vector.shape_cast %55 : vector<8x256xf32> to vector<1x8x256xf32>
    tpu.vector_store %arg4[%c0_14, %c0_15, %c256], %58 {strides = array<i32>} : memref<1x8x512xf32, #tpu.memory_space<vmem>>, vector<1x8x256xf32>,
    return
  }
  func.func @transform_0(%arg0: i32) -> (i32, i32) {
    %c0_i32 = arith.constant 0 : i32
    %c0_i32_0 = arith.constant 0 : i32
    %c0_i32_1 = arith.constant 0 : i32
    return %c0_i32, %c0_i32_0 : i32, i32
  }
  func.func @transform_1(%arg0: i32) -> (i32, i32) {
    %c0_i32 = arith.constant 0 : i32
    %c0_i32_0 = arith.constant 0 : i32
    %c0_i32_1 = arith.constant 0 : i32
    return %c0_i32, %c0_i32_0 : i32, i32
  }
  func.func @transform_2(%arg0: i32) -> (i32, i32, i32) {
    %c0_i32 = arith.constant 0 : i32
    %c0_i32_0 = arith.constant 0 : i32
    %c0_i32_1 = arith.constant 0 : i32
    return %arg0, %c0_i32, %c0_i32_0 : i32, i32, i32
  }
  func.func @transform_3(%arg0: i32) -> (i32, i32, i32) {
    %c0_i32 = arith.constant 0 : i32
    %c0_i32_0 = arith.constant 0 : i32
    %c0_i32_1 = arith.constant 0 : i32
    return %arg0, %c0_i32, %c0_i32_0 : i32, i32, i32
  }
}

</mosaic_0001>

<bundles_post_ra>
// kernel: grayscale_block_forward.3
= control target key start
LH: loop header
LB: loop body
LE: loop exit
PB: predicated region body
PF: predicated region fallthrough
CT: control target
= control target key end

     0   :  { %s490_s12 = smov 0   ;;  %s554_s0 = inlined_call_operand.vmem [shape: f32[6,256], index: 0, kind: input, shape index: {}]   ;;  %s555_s1 = inlined_call_operand.vmem [shape: f32[8,6], index: 1, kind: input, shape index: {}]   ;;  %s556_s2 = inlined_call_operand.vmem [shape: f32[2,8,256], index: 2, kind: input, shape index: {}]   ;;  %s557_s3 = inlined_call_operand.vmem [shape: f32[2,8,512], index: 3, kind: output, shape index: {}]  }
   0x1 LB: > { %s409_s13 = sadd.s32 4294967295, %s458_s12   ;;  %p413_p0 = scmp.ge.s32.totalorder %s458_s12, 1  ;;  %s458_s12 = sphi %s490_s12, %s13_s12  }
   0x2   : > { %p137_p1 = scmp.lt.s32.totalorder %s458_s12, 3 }
   0x4   : > { %p138_p2 = pnand %p413_p0, %p137_p1 }
   0x5   : > { %p161_p3 = scmp.lt.s32.totalorder (!%p138_p2), %s409_s13, 1  ;;  %s462_s18 = smov (!%p138_p2), 126  }
   0x6   : > { %141 = sbr.rel (%p138_p2) target bundleno = 288 (0x120), region = 32  ;;  %s463_s19 = smov (!%p138_p2), 2  }
   0x7   : > { %s467_s28 = smov (!%p138_p2), 32   ;;  %s468_s29 = smov (!%p138_p2), 96  }
   0xb   : > { %v460_v0 = vmov 1   ;;  %s559_s13 = smov (!%p161_p3, %s409_s13), 1  ;;  %v461_v1 = vmov 0   ;;  %v304_v4 = vld [vmem:[%s555_s1] sm:$0xff]  ;;  %v464_v5 = vmov 3   ;;  %v465_v6 = vmov 4  }
   0xc   : > { %446 = vset.pattern.permute.xlu1 %v460_v0  ;;  %445 = vset.pattern.permute.xlu0 %v461_v1  ;;  %s425_s14 = sshll.u32 %s559_s13, 4  ;;  %v466_v7 = vmov 2   ;;  %v178_v8 = vlaneseq  ;;  %v418_v12 = vld [vmem:[%s554_s0 + $0x1] ss:$8 sm:$0x3]  ;;  %v469_v40 = vmov 5  }
   0xd   : > { %s165_s17 = scalar_lea.vmem %s556_s2, %s425_s14  ;;  %v173_v14 = vld [vmem:[%s554_s0] ss:$8 sm:$0x3]  ;;  %v419_v19 = vld [vmem:[%s554_s0 + $0x2] ss:$8 sm:$0x3] }
   0xe   : > { %v171_v2 = vld [vmem:[%s165_s17] sm:$0xff]  ;;  %v172_v3 = vld [vmem:[%s165_s17 + $0x8] sm:$0xff]  ;;  %v185_v9 = vshrl.u32 %v178_v8, 7  ;;  %v514_v13 = vand.u32 127, %v178_v8  ;;  %s426_s9 = sshll.u32 %s559_s13, 5 }
   0xf   : > { %215 = vrot.lane.b32.xlu1 %v171_v2, %s462_s18  ;;  %174 = vrot.lane.b32.xlu0 %v171_v2, %s463_s19  ;;  %v420_v44 = vld [vmem:[%s554_s0 + $0x3] ss:$8 sm:$0x3]  ;;  %v421_v47 = vld [vmem:[%s554_s0 + $0x4] ss:$8 sm:$0x3]  ;;  %s170_s14 = scalar_lea.vmem %s557_s3, %s426_s9 }
  0x10   : > { %v507_v10 = vsub.s32 0, %v185_v9  ;;  %v509_v11 = vsub.s32 1, %v185_v9  ;;  %vm219_vm0 = vcmp.lt.s32.totalorder %v514_v13, 126  ;;  %vm180_vm1 = vcmp.lt.s32.totalorder %v514_v13, 2 }
  0x11   : > { %vm243_vm2 = vcmp.lt.s32.totalorder %v514_v13, 32  ;;  %v422_v52 = vld [vmem:[%s554_s0 + $0x5] ss:$8 sm:$0x3]  ;;  %vm282_vm3 = vcmp.lt.s32.totalorder %v514_v13, 96 }
  0x12   : > { %v202_v15 = vrot.slane %v418_v12, %v507_v10  ;;  %v206_v16 = vrot.slane %v418_v12, %v509_v11  ;;  %v187_v20 = vrot.slane %v173_v14, %v507_v10  ;;  %v191_v21 = vrot.slane %v173_v14, %v509_v11 }
  0x13   : > { %217 = vrot.lane.b32.xlu1 %v172_v3, %s462_s18  ;;  %176 = vrot.lane.b32.xlu0 %v172_v3, %s463_s19  ;;  %v226_v24 = vrot.slane %v419_v19, %v507_v10  ;;  %v230_v25 = vrot.slane %v419_v19, %v509_v11  ;;  %v250_v48 = vrot.slane %v420_v44, %v507_v10 }
  0x14   : > { %v209_v22 = vmul.f32 %v202_v15, %v171_v2  ;;  %v210_v23 = vmul.f32 %v206_v16, %v172_v3  ;;  %v254_v49 = vrot.slane %v420_v44, %v509_v11  ;;  %v265_v53 = vrot.slane %v421_v47, %v507_v10 }
  0x15   : > { %v269_v54 = vrot.slane %v421_v47, %v509_v11  ;;  %v289_v58 = vrot.slane %v422_v52, %v507_v10  ;;  %v293_v59 = vrot.slane %v422_v52, %v509_v11 }
  0x17   : > { %313 = vperm.xlu1 %446, %v304_v4   ;;  %307 = vperm.xlu0 %445, %v304_v4  }
  0x1b   : > { %447 = vset.pattern.permute.xlu1 %v464_v5  ;;  %448 = vset.pattern.permute.xlu0 %v465_v6 }
  0x1c   : > { %331 = vperm.xlu1 %447, %v304_v4  }
  0x20   : > { %449 = vset.pattern.permute.xlu1 %v466_v7 }
  0x81   : > { %v216_v17 = vpop.permute.xlu1 %215  ;;  %v175_v18 = vpop.permute.xlu0 %174 }
  0x85   : > { %v218_v26 = vpop.permute.xlu1 %217  ;;  %v177_v27 = vpop.permute.xlu0 %176 }
  0x86   : > { %v220_v28 = vsel %vm219_vm0, %v216_v17, %v218_v26  ;;  %v221_v29 = vsel %vm219_vm0, %v218_v26, %v216_v17  ;;  %v181_v30 = vsel %vm180_vm1, %v175_v18, %v177_v27  ;;  %v182_v31 = vsel %vm180_vm1, %v177_v27, %v175_v18 }
  0x87   : > { %v194_v32 = vmul.f32 %v187_v20, %v182_v31  ;;  %v195_v33 = vmul.f32 %v191_v21, %v181_v30  ;;  %v233_v34 = vmul.f32 %v226_v24, %v220_v28  ;;  %v234_v35 = vmul.f32 %v230_v25, %v221_v29 }
  0x89   : > { %v211_v36 = vadd.f32 %v209_v22, %v194_v32  ;;  %v212_v37 = vadd.f32 %v210_v23, %v195_v33 }
  0x8b   : > { %v236_v38 = vadd.f32 %v234_v35, %v212_v37  ;;  %v235_v39 = vadd.f32 %v233_v34, %v211_v36 }
  0x8d   : > { %241 = vrot.lane.b32.xlu1 %v236_v38, %s467_s28  ;;  %239 = vrot.lane.b32.xlu0 %v235_v39, %s467_s28  ;;  %v273_v61 = vmul.f32 %v269_v54, %v236_v38  ;;  %v272_v62 = vmul.f32 %v265_v53, %v235_v39 }
  0x91   : > { %321 = vperm.xlu1 %449, %v304_v4   ;;  %278 = vrot.lane.b32.xlu0 %v235_v39, %s468_s29 }
  0x92   : > { %v314_v41 = vpop.permute.xlu1 %313  ;;  %v308_v43 = vpop.permute.xlu0 %307 }
  0x95   : > { %280 = vrot.lane.b32.xlu1 %v236_v38, %s468_s29  ;;  %337 = vperm.xlu0 %448, %v304_v4  }
  0x96   : > { %450 = vset.pattern.permute.xlu1 %v469_v40 }
  0x97   : > { %v332_v42 = vpop.permute.xlu1 %331 }
  0x99   : > { %345 = vperm.xlu1 %450, %v304_v4   ;;  %451 = vset.pattern.permute.xlu0 %v469_v40 }
  0xff   : > { %v242_v45 = vpop.permute.xlu1 %241  ;;  %v240_v46 = vpop.permute.xlu0 %239 }
 0x100   : > { %v244_v50 = vsel %vm243_vm2, %v240_v46, %v242_v45  ;;  %v245_v51 = vsel %vm243_vm2, %v242_v45, %v240_v46 }
 0x101   : > { %v257_v56 = vmul.f32 %v250_v48, %v245_v51  ;;  %v258_v57 = vmul.f32 %v254_v49, %v244_v50 }
 0x103   : > { %v279_v60 = vpop.permute.xlu0 %278  ;;  %v274_v2 = vadd.f32 %v272_v62, %v257_v56  ;;  %v275_v3 = vadd.f32 %v273_v61, %v258_v57 }
 0x10c   : > { %v322_v55 = vpop.permute.xlu1 %321 }
 0x110   : > { %v281_v63 = vpop.permute.xlu1 %280  ;;  %v338_v6 = vpop.permute.xlu0 %337 }
 0x111   : > { %v283_v0 = vsel %vm282_vm3, %v279_v60, %v281_v63  ;;  %v284_v1 = vsel %vm282_vm3, %v281_v63, %v279_v60 }
 0x112   : > { %v296_v4 = vmul.f32 %v289_v58, %v283_v0  ;;  %v297_v5 = vmul.f32 %v293_v59, %v284_v1 }
 0x114   : > { %v298_v7 = vadd.f32 %v296_v4, %v274_v2  ;;  %v299_v8 = vadd.f32 %v297_v5, %v275_v3  ;;  %v346_v14 = vpop.permute.xlu1 %345 }
 0x116   : > { %v301_v9 = vrot.slane %v299_v8, 7  ;;  %v300_v12 = vrot.slane %v298_v7, 7  ;;  %v340_v13 = vmul.f32 %v338_v6, %v298_v7  ;;  %v341_v10 = vmul.f32 %v338_v6, %v299_v8 }
 0x117   : > { %v302_v11 = vrot.slane %v298_v7, 1  ;;  %v303_v15 = vrot.slane %v299_v8, 1  ;;  %v316_v16 = vmul.f32 %v314_v41, %v298_v7  ;;  %v317_v17 = vmul.f32 %v314_v41, %v299_v8 }
 0x118   : > { %v311_v18 = vmul.f32 %v308_v43, %v301_v9  ;;  %v335_v19 = vmul.f32 %v332_v42, %v301_v9  ;;  %v310_v20 = vmul.f32 %v308_v43, %v300_v12  ;;  %v334_v21 = vmul.f32 %v332_v42, %v300_v12 }
 0x119   : > { %v324_v22 = vmul.f32 %v322_v55, %v302_v11  ;;  %v325_v23 = vmul.f32 %v322_v55, %v303_v15  ;;  %v348_v24 = vmul.f32 %v346_v14, %v302_v11  ;;  %v349_v25 = vmul.f32 %v346_v14, %v303_v15 }
 0x11a   : > { %v342_v26 = vadd.f32 %v340_v13, %v334_v21  ;;  %v343_v27 = vadd.f32 %v341_v10, %v335_v19  ;;  %v318_v28 = vadd.f32 %v316_v16, %v310_v20  ;;  %v319_v29 = vadd.f32 %v317_v17, %v311_v18 }
 0x11c   : > { %v326_v30 = vadd.f32 %v324_v22, %v318_v28  ;;  %v327_v31 = vadd.f32 %v325_v23, %v319_v29  ;;  %v350_v32 = vadd.f32 %v348_v24, %v342_v26  ;;  %v351_v33 = vadd.f32 %v349_v25, %v343_v27 }
 0x11e   : > { %328 = vst [vmem:[%s170_s14] sm:$0xff] %v326_v30  ;;  %329 = vst [vmem:[%s170_s14 + $0x8] sm:$0xff] %v327_v31 }
 0x11f   : > { %352 = vst [vmem:[%s170_s14 + $0x10] sm:$0xff] %v350_v32  ;;  %353 = vst [vmem:[%s170_s14 + $0x18] sm:$0xff] %v351_v33 }
 0x120 PF: > { %s13_s12 = sadd.s32 1, %s458_s12  }
 0x121   : > { %p10_p4 = scmp.ge.s32.totalorder %s13_s12, 4  }
 0x123   :  { %12 = sbr.rel (!%p10_p4) target bundleno = 1 (0x1), region = 67 }

// kernel: grayscale_block_forward.2
= control target key start
LH: loop header
LB: loop body
LE: loop exit
PB: predicated region body
PF: predicated region fallthrough
CT: control target
= control target key end

     0   :  { %8 = vsyncpa [#allocation3], 0  ;;  %s559_s12 = smov 0   ;;  %s561_s13 = smov 0   ;;  %s622_s0 = inlined_call_operand.vmem [shape: f32[2,4], index: 0, kind: input, shape index: {}]   ;;  %s623_s1 = inlined_call_operand.vmem [shape: f32[2,4,8,128], index: 1, kind: input, shape index: {}]   ;;  %s624_s2 = inlined_call_operand.vmem [shape: f32[2,8,128], index: 2, kind: input, shape index: {}]   ;;  %s625_s3 = inlined_call_operand.vmem [shape: f32[2,8,128], index: 3, kind: output, shape index: {}]  }
   0x1   :  { %s563_s14 = smov 0  }
   0x2 LB: > { %s439_s15 = sadd.s32 4294967295, %s536_s14   ;;  %s33_s16 = sadd.s32 1, %s532_s13  ;;  %s536_s14 = sphi %s563_s14, %s14_s14   ;;  %s532_s13 = sphi %s561_s13, %s629_s13   ;;  %s528_s12 = sphi %s559_s12, %s628_s12  }
   0x3   : > { %p35_p0 = scmp.ge.s32.totalorder %s33_s16, 2  ;;  %p441_p1 = scmp.ge.s32.totalorder %s536_s14, 1 }
   0x4   : > { %p145_p2 = scmp.lt.s32.totalorder %s536_s14, 3  ;;  %p584_p4 = scmp.eq.s32.totalorder %s439_s15, 0 }
   0x5   : > { %s631_s16 = smov (%p35_p0, %s33_s16), 0  ;;  %s158_s21 = sshll.u32 %s622_s0, 4  ;;  %s159_s21 = int_to_ptr.vmem [resolvable:$true] %s158_s21 }
   0x6   : > { %p580_p3 = pnand %p441_p1, %p145_p2  ;;  %s495_s22 = scalar_lea.vmem %s159_s21, 32 }
   0x7   : > { %p496_p7 = scmp.ne.s32.totalorder %s159_s21, %s495_s22  ;;  %p503_p11 = scmp.lt.s32.totalorder %s159_s21, %s159_s21 }
   0x8   : > { %p464_p5 = pneg %p580_p3  ;;  %p504_p12 = scmp.lt.s32.totalorder %s495_s22, %s495_s22 }
   0xa   : > { %p465_p6 = pnand %p584_p4, %p464_p5  ;;  %p505_p13 = por %p504_p12, %p503_p11 }
   0xc   : > { %p497_p8 = pneg %p465_p6 }
   0xe   : > { %p498_p9 = pnand %p497_p8, %p496_p7 }
  0x10   : > { %p499_p10 = pneg %p498_p9 }
  0x12   : > { %p506_p0 = pnand %p505_p13, %p499_p10 }
  0x14   : > { %509 = shalt.err (!%p506_p0)
}
  0x15   : > { %s538_s23 = smov [#allocation2]   ;;  %197 = sbr.rel (%p580_p3) target bundleno = 48 (0x30), region = 32 }
  0x16   : > { %467 = dma.vmem_to_smem (!%p465_p6), %s159_s21, 32, %s538_s23, [#allocation3]  }
  0x1a   : > { %523 = dma.done.wait (%p584_p4), [#allocation3], 32  }
  0x1b   : > { %525 = vsyncadd (%p584_p4), [#allocation3], 4294967264 }
  0x1c   : > { %203 = sfence }
  0x1d   : > { %p239_p1 = scmp.lt.s32.totalorder %s528_s12, 1  ;;  %s450_s24 = sshll.u32 %s528_s12, 7 }
  0x1e   : > { %s280_s25 = sld [smem:[#allocation2 + %s450_s24]]  ;;  %s292_s26 = sadd.s32 1, %s450_s24 }
  0x1f   : > { %s633_s12 = smov (!%p239_p1, %s528_s12), 1  ;;  %s293_s27 = sld [smem:[#allocation2 + %s292_s26]] }
  0x20   : > { %s306_s28 = sadd.s32 2, %s450_s24  ;;  %s459_s29 = sshll.u32 %s633_s12, 5 }
  0x21   : > { %s448_s30 = sshll.u32 %s633_s12, 3  ;;  %s249_s6 = scalar_lea.vmem %s623_s1, %s459_s29 }
  0x22   : > { %s257_s9 = scalar_lea.vmem %s624_s2, %s448_s30  ;;  %s307_s10 = sld [smem:[#allocation2 + %s306_s28]]  ;;  %v281_v1 = vld [vmem:[%s249_s6] sm:$0xff]  ;;  %v452_v3 = vld [vmem:[%s249_s6 + $0x8] sm:$0xff]  ;;  %v454_v6 = vld [vmem:[%s249_s6 + $0x10] sm:$0xff] }
  0x23   : > { %v269_v0 = vld [vmem:[%s257_s9] sm:$0xff]  ;;  %s320_s11 = sadd.s32 3, %s450_s24  ;;  %v456_v9 = vld [vmem:[%s249_s6 + $0x18] sm:$0xff]  ;;  %s264_s18 = scalar_lea.vmem %s625_s3, %s448_s30 }
  0x24   : > { %v282_v2 = vstv %s280_s25  ;;  %s321_s15 = sld [smem:[#allocation2 + %s320_s11]] }
  0x25   : > { %v283_v4 = vmul.f32 %v282_v2, %v281_v1  ;;  %v296_v5 = vstv %s293_s27 }
  0x26   : > { %v297_v8 = vmul.f32 %v452_v3, %v296_v5 }
  0x27   : > { %v284_v7 = vadd.f32 %v283_v4, %v269_v0 }
  0x28   : > { %v310_v11 = vstv %s307_s10 }
  0x29   : > { %v298_v10 = vadd.f32 %v297_v8, %v284_v7  ;;  %v311_v12 = vmul.f32 %v454_v6, %v310_v11 }
  0x2a   : > { %v324_v13 = vstv %s321_s15 }
  0x2b   : > { %v312_v14 = vadd.f32 %v311_v12, %v298_v10  ;;  %v325_v15 = vmul.f32 %v456_v9, %v324_v13 }
  0x2d   : > { %v326_v16 = vadd.f32 %v325_v15, %v312_v14 }
  0x2f   : > { %327 = vst [vmem:[%s264_s18] sm:$0xff] %v326_v16 }
  0x30 PF: > { %s14_s14 = sadd.s32 1, %s536_s14   ;;  %s628_s12 = smov %s532_s13 }
  0x31   : > { %p11_p2 = scmp.ge.s32.totalorder %s14_s14, 4   ;;  %s629_s13 = smov %s631_s16 }
  0x33   :  { %13 = sbr.rel (!%p11_p2) target bundleno = 2 (0x2), region = 77 }
  0x38   :  { %353 = vsyncpa [#allocation3], 1 }
  0x39   :  { %355 = vsyncpa [#allocation3 + $0x1], 1 }

</bundles_post_ra>
